<compile_context>
chip_gen: v7x
topology: tpu7x:2x2x1
jax: 0.10.0
libtpu: 0.0.40
codegen_flags: <defaults>
</compile_context>

<pallas_src>
import functools

import jax
import jax.numpy as jnp
from jax import lax
from jax.experimental import pallas as pl
from jax.experimental.pallas import tpu as pltpu

# Contract lhs dim 1 with rhs dim 1 (trans_b-style matvec).
_CONTRACT_LAST = (((1,), (1,)), ((), ()))


def _sinkhorn_kernel(s_ref, o_ref, *, max_iter, epsilon):
    n, m = o_ref.shape

    # S0 = s + eps, materialized once into the output block (resident buffer);
    # s_ref is never read again, so only the in/out blocks plus short-lived
    # Mosaic temps stay live in VMEM.
    o_ref[...] = s_ref[0].astype(jnp.float32) + epsilon

    n_pairs = max_iter // 2          # full (column, row) normalization pairs

    if n_pairs > 0:
        def pair(r):
            s0 = o_ref[...]
            # column step: c_j = 1 / sum_i r_i * S0_ij          (MXU matvec)
            c = 1.0 / jnp.dot(r, s0, preferred_element_type=jnp.float32)
            # row step:    r_i = 1 / sum_j S0_ij * c_j          (MXU matvec)
            r_new = 1.0 / lax.dot_general(
                c, s0, _CONTRACT_LAST, preferred_element_type=jnp.float32)
            # Keep the diagonal factor bounded in f32; the final result is
            # invariant to a uniform rescale of r (it cancels in the final
            # normalization), so this only costs a tiny vector reduce.
            return r_new * (1.0 / jnp.max(jnp.abs(r_new), axis=1, keepdims=True))

        r = jnp.ones((1, n), jnp.float32)
        n_lead = n_pairs - 1         # all pairs except the last (fused below)
        if n_lead <= 16:             # static & short: full unroll (LLO visibility)
            for _ in range(n_lead):
                r = pair(r)
        else:                        # very large max_iter: keep code size sane
            r = lax.fori_loop(0, n_lead, lambda _, rr: pair(rr), r, unroll=4)

        # Last (column, row) pair fused into the single full-matrix write.
        s0 = o_ref[...]
        c = 1.0 / jnp.dot(r, s0, preferred_element_type=jnp.float32)      # (1, M)
        # rowsum(S0 * c) == S0 @ c : same trans_b MXU matvec -> (N, 1).
        row_sums = lax.dot_general(
            s0, c, _CONTRACT_LAST, preferred_element_type=jnp.float32)    # (N, 1)
        a = s0 * c * (1.0 / row_sums)
        if max_iter % 2 == 1:        # odd max_iter ends on a column step
            a = a * (1.0 / jnp.sum(a, axis=0, keepdims=True))
        o_ref[...] = a
    elif max_iter % 2 == 1:          # max_iter == 1: a single column step
        a = o_ref[...]
        o_ref[...] = a * (1.0 / jnp.sum(a, axis=0, keepdims=True))
    # max_iter == 0: o_ref already holds S0 = s + eps.


def _device_vmem_bytes():
    try:
        return int(pltpu.get_tpu_info().vmem_capacity_bytes)
    except Exception:
        return 64 << 20              # conservative: v7x per-TensorCore VMEM


def _vmem_limit_bytes(n, m):
    cap = _device_vmem_bytes()
    # Footprint: input block + output block (resident S0) + ~2 full-matrix
    # Mosaic temps for matvec operands / epilogue, plus slack.  Always set it
    # (v5e's scoped default is only 16 MiB) and cap below physical VMEM.
    needed = 4 * (n * m * 4) + (4 << 20)
    return int(min(max(needed, 32 << 20), (cap * 9) // 10))


@functools.partial(jax.jit, static_argnames=("max_iter", "epsilon"))
def _sinkhorn_impl(s, *, max_iter, epsilon):
    n, m = s.shape[1], s.shape[2]
    kernel = functools.partial(_sinkhorn_kernel, max_iter=max_iter, epsilon=epsilon)
    return pl.pallas_call(
        kernel,
        out_shape=jax.ShapeDtypeStruct((n, m), jnp.float32),
        in_specs=[pl.BlockSpec((1, n, m), lambda: (0, 0, 0))],
        out_specs=pl.BlockSpec((n, m), lambda: (0, 0)),
        compiler_params=pltpu.CompilerParams(
            vmem_limit_bytes=_vmem_limit_bytes(n, m)),
    )(s)


def sinkhorn(s, max_iter=10, epsilon=1e-4):
    """s: (1, N, M) -> (N, M) float32 (the module's squeeze(0), batch==1 path)."""
    assert s.ndim == 3 and s.shape[0] == 1, "kernel implements the batch==1 path"
    # TODO(synk): dummy_row / nrows / ncols / exp paths (data-dependent,
    # per-batch slicing) are off by default and not implemented.
    # TODO(synk): matrices too large for VMEM need a streamed / bf16-resident
    # variant (emit_pipeline over row tiles); likewise an optional 2-TensorCore
    # split on v7x and lane-padding for small / odd M.
    return _sinkhorn_impl(s, max_iter=int(max_iter), epsilon=float(epsilon))


def _sinkhorn_ref(s, max_iter=10, epsilon=1e-4):
    x = s[0].astype(jnp.float32) + epsilon
    for i in range(max_iter):
        if i % 2 == 1:
            x = x / jnp.sum(x, axis=1, keepdims=True)
        else:
            x = x / jnp.sum(x, axis=0, keepdims=True)
    return x


if __name__ == "__main__":
    key = jax.random.PRNGKey(0)
    k1, k2 = jax.random.split(key)

    # Small shape consistent with the forward: batch=1, 16x16 affinity matrix.
    s1 = jax.random.uniform(k1, (1, 16, 16), dtype=jnp.float32)
    ref1 = _sinkhorn_ref(s1)
    out1 = jax.block_until_ready(sinkhorn(s1))
    assert out1.shape == (16, 16)
    assert jnp.allclose(out1, ref1, atol=1e-5, rtol=1e-5), float(
        jnp.max(jnp.abs(out1 - ref1)))

    # Lane-dense shape (N mult of 8, M mult of 128): unmasked epilogue stores.
    s2 = jax.random.uniform(k2, (1, 64, 128), dtype=jnp.float32)
    ref2 = _sinkhorn_ref(s2)
    out2 = jax.block_until_ready(sinkhorn(s2))
    assert jnp.allclose(out2, ref2, atol=1e-5, rtol=1e-5), float(
        jnp.max(jnp.abs(out2 - ref2)))

    # Odd max_iter exercises the trailing column-normalization branch.
    ref3 = _sinkhorn_ref(s1, max_iter=7)
    out3 = jax.block_until_ready(sinkhorn(s1, max_iter=7))
    assert jnp.allclose(out3, ref3, atol=1e-5, rtol=1e-5), float(
        jnp.max(jnp.abs(out3 - ref3)))

    print("KERNEL_OK")
</pallas_src>

<mosaic_0001>
module attributes {stable_mosaic.version = 11 : i64} {
  func.func @_sinkhorn_kernel(%arg0: memref<1x16x16xf32, #tpu.memory_space<vmem>>, %arg1: memref<16x16xf32, #tpu.memory_space<vmem>>) attributes {dimension_semantics = [], scalar_prefetch = 0 : i64, scratch_operands = 0 : i64, tpu.core_type = #tpu.core_type<tc>} {
    %c0 = arith.constant 0 : index
    %c0_0 = arith.constant 0 : index
    %c0_1 = arith.constant 0 : index
    %0 = vector.load %arg0[%c0, %c0_0, %c0_1] : memref<1x16x16xf32, #tpu.memory_space<vmem>>, vector<1x16x16xf32>
    %1 = vector.shape_cast %0 : vector<1x16x16xf32> to vector<16x16xf32>
    %cst = arith.constant 9.99999974E-5 : f32
    %2 = vector.broadcast %cst : f32 to vector<16x16xf32>
    %3 = arith.addf %1, %2 : vector<16x16xf32>
    %c0_2 = arith.constant 0 : index
    %c0_3 = arith.constant 0 : index
    %4 = vector.load %arg1[%c0_2, %c0_3] : memref<16x16xf32, #tpu.memory_space<vmem>>, vector<16x16xf32>
    tpu.vector_store %arg1[%c0_2, %c0_3], %3 {strides = array<i32>} : memref<16x16xf32, #tpu.memory_space<vmem>>, vector<16x16xf32>,
    %cst_4 = arith.constant 1.000000e+00 : f32
    %5 = vector.broadcast %cst_4 : f32 to vector<1x16xf32>
    %c0_5 = arith.constant 0 : index
    %c0_6 = arith.constant 0 : index
    %6 = vector.load %arg1[%c0_5, %c0_6] : memref<16x16xf32, #tpu.memory_space<vmem>>, vector<16x16xf32>
    %cst_7 = arith.constant dense<0.000000e+00> : vector<1x16xf32>
    %7 = tpu.matmul %5, %6, %cst_7 {dimension_numbers = #tpu.dot_dimension_numbers<[1], [0], [0], [1], [0, 0, 1, 1], [], []>} : vector<1x16xf32>, vector<16x16xf32>, vector<1x16xf32> -> vector<1x16xf32>
    %cst_8 = arith.constant 1.000000e+00 : f32
    %8 = vector.broadcast %cst_8 : f32 to vector<1x16xf32>
    %9 = arith.divf %8, %7 : vector<1x16xf32>
    %cst_9 = arith.constant dense<0.000000e+00> : vector<1x16xf32>
    %10 = tpu.matmul %9, %6, %cst_9 {dimension_numbers = #tpu.dot_dimension_numbers<[1], [1], [0], [0], [0, 0, 1, 0], [], []>} : vector<1x16xf32>, vector<16x16xf32>, vector<1x16xf32> -> vector<1x16xf32>
    %cst_10 = arith.constant 1.000000e+00 : f32
    %11 = vector.broadcast %cst_10 : f32 to vector<1x16xf32>
    %12 = arith.divf %11, %10 : vector<1x16xf32>
    %13 = math.absf %12 : vector<1x16xf32>
    %cst_11 = arith.constant dense<0xFF800000> : vector<1xf32>
    %14 = vector.multi_reduction <maximumf>, %13, %cst_11 [1] : vector<1x16xf32> to vector<1xf32>
    %15 = vector.shape_cast %14 : vector<1xf32> to vector<1x1xf32>
    %cst_12 = arith.constant 1.000000e+00 : f32
    %16 = vector.broadcast %cst_12 : f32 to vector<1x1xf32>
    %17 = arith.divf %16, %15 : vector<1x1xf32>
    %18 = vector.broadcast %17 : vector<1x1xf32> to vector<1x16xf32>
    %19 = arith.mulf %12, %18 : vector<1x16xf32>
    %c0_13 = arith.constant 0 : index
    %c0_14 = arith.constant 0 : index
    %20 = vector.load %arg1[%c0_13, %c0_14] : memref<16x16xf32, #tpu.memory_space<vmem>>, vector<16x16xf32>
    %cst_15 = arith.constant dense<0.000000e+00> : vector<1x16xf32>
    %21 = tpu.matmul %19, %20, %cst_15 {dimension_numbers = #tpu.dot_dimension_numbers<[1], [0], [0], [1], [0, 0, 1, 1], [], []>} : vector<1x16xf32>, vector<16x16xf32>, vector<1x16xf32> -> vector<1x16xf32>
    %cst_16 = arith.constant 1.000000e+00 : f32
    %22 = vector.broadcast %cst_16 : f32 to vector<1x16xf32>
    %23 = arith.divf %22, %21 : vector<1x16xf32>
    %cst_17 = arith.constant dense<0.000000e+00> : vector<1x16xf32>
    %24 = tpu.matmul %23, %20, %cst_17 {dimension_numbers = #tpu.dot_dimension_numbers<[1], [1], [0], [0], [0, 0, 1, 0], [], []>} : vector<1x16xf32>, vector<16x16xf32>, vector<1x16xf32> -> vector<1x16xf32>
    %cst_18 = arith.constant 1.000000e+00 : f32
    %25 = vector.broadcast %cst_18 : f32 to vector<1x16xf32>
    %26 = arith.divf %25, %24 : vector<1x16xf32>
    %27 = math.absf %26 : vector<1x16xf32>
    %cst_19 = arith.constant dense<0xFF800000> : vector<1xf32>
    %28 = vector.multi_reduction <maximumf>, %27, %cst_19 [1] : vector<1x16xf32> to vector<1xf32>
    %29 = vector.shape_cast %28 : vector<1xf32> to vector<1x1xf32>
    %cst_20 = arith.constant 1.000000e+00 : f32
    %30 = vector.broadcast %cst_20 : f32 to vector<1x1xf32>
    %31 = arith.divf %30, %29 : vector<1x1xf32>
    %32 = vector.broadcast %31 : vector<1x1xf32> to vector<1x16xf32>
    %33 = arith.mulf %26, %32 : vector<1x16xf32>
    %c0_21 = arith.constant 0 : index
    %c0_22 = arith.constant 0 : index
    %34 = vector.load %arg1[%c0_21, %c0_22] : memref<16x16xf32, #tpu.memory_space<vmem>>, vector<16x16xf32>
    %cst_23 = arith.constant dense<0.000000e+00> : vector<1x16xf32>
    %35 = tpu.matmul %33, %34, %cst_23 {dimension_numbers = #tpu.dot_dimension_numbers<[1], [0], [0], [1], [0, 0, 1, 1], [], []>} : vector<1x16xf32>, vector<16x16xf32>, vector<1x16xf32> -> vector<1x16xf32>
    %cst_24 = arith.constant 1.000000e+00 : f32
    %36 = vector.broadcast %cst_24 : f32 to vector<1x16xf32>
    %37 = arith.divf %36, %35 : vector<1x16xf32>
    %cst_25 = arith.constant dense<0.000000e+00> : vector<1x16xf32>
    %38 = tpu.matmul %37, %34, %cst_25 {dimension_numbers = #tpu.dot_dimension_numbers<[1], [1], [0], [0], [0, 0, 1, 0], [], []>} : vector<1x16xf32>, vector<16x16xf32>, vector<1x16xf32> -> vector<1x16xf32>
    %cst_26 = arith.constant 1.000000e+00 : f32
    %39 = vector.broadcast %cst_26 : f32 to vector<1x16xf32>
    %40 = arith.divf %39, %38 : vector<1x16xf32>
    %41 = math.absf %40 : vector<1x16xf32>
    %cst_27 = arith.constant dense<0xFF800000> : vector<1xf32>
    %42 = vector.multi_reduction <maximumf>, %41, %cst_27 [1] : vector<1x16xf32> to vector<1xf32>
    %43 = vector.shape_cast %42 : vector<1xf32> to vector<1x1xf32>
    %cst_28 = arith.constant 1.000000e+00 : f32
    %44 = vector.broadcast %cst_28 : f32 to vector<1x1xf32>
    %45 = arith.divf %44, %43 : vector<1x1xf32>
    %46 = vector.broadcast %45 : vector<1x1xf32> to vector<1x16xf32>
    %47 = arith.mulf %40, %46 : vector<1x16xf32>
    %c0_29 = arith.constant 0 : index
    %c0_30 = arith.constant 0 : index
    %48 = vector.load %arg1[%c0_29, %c0_30] : memref<16x16xf32, #tpu.memory_space<vmem>>, vector<16x16xf32>
    %cst_31 = arith.constant dense<0.000000e+00> : vector<1x16xf32>
    %49 = tpu.matmul %47, %48, %cst_31 {dimension_numbers = #tpu.dot_dimension_numbers<[1], [0], [0], [1], [0, 0, 1, 1], [], []>} : vector<1x16xf32>, vector<16x16xf32>, vector<1x16xf32> -> vector<1x16xf32>
    %cst_32 = arith.constant 1.000000e+00 : f32
    %50 = vector.broadcast %cst_32 : f32 to vector<1x16xf32>
    %51 = arith.divf %50, %49 : vector<1x16xf32>
    %cst_33 = arith.constant dense<0.000000e+00> : vector<1x16xf32>
    %52 = tpu.matmul %51, %48, %cst_33 {dimension_numbers = #tpu.dot_dimension_numbers<[1], [1], [0], [0], [0, 0, 1, 0], [], []>} : vector<1x16xf32>, vector<16x16xf32>, vector<1x16xf32> -> vector<1x16xf32>
    %cst_34 = arith.constant 1.000000e+00 : f32
    %53 = vector.broadcast %cst_34 : f32 to vector<1x16xf32>
    %54 = arith.divf %53, %52 : vector<1x16xf32>
    %55 = math.absf %54 : vector<1x16xf32>
    %cst_35 = arith.constant dense<0xFF800000> : vector<1xf32>
    %56 = vector.multi_reduction <maximumf>, %55, %cst_35 [1] : vector<1x16xf32> to vector<1xf32>
    %57 = vector.shape_cast %56 : vector<1xf32> to vector<1x1xf32>
    %cst_36 = arith.constant 1.000000e+00 : f32
    %58 = vector.broadcast %cst_36 : f32 to vector<1x1xf32>
    %59 = arith.divf %58, %57 : vector<1x1xf32>
    %60 = vector.broadcast %59 : vector<1x1xf32> to vector<1x16xf32>
    %61 = arith.mulf %54, %60 : vector<1x16xf32>
    %c0_37 = arith.constant 0 : index
    %c0_38 = arith.constant 0 : index
    %62 = vector.load %arg1[%c0_37, %c0_38] : memref<16x16xf32, #tpu.memory_space<vmem>>, vector<16x16xf32>
    %cst_39 = arith.constant dense<0.000000e+00> : vector<1x16xf32>
    %63 = tpu.matmul %61, %62, %cst_39 {dimension_numbers = #tpu.dot_dimension_numbers<[1], [0], [0], [1], [0, 0, 1, 1], [], []>} : vector<1x16xf32>, vector<16x16xf32>, vector<1x16xf32> -> vector<1x16xf32>
    %cst_40 = arith.constant 1.000000e+00 : f32
    %64 = vector.broadcast %cst_40 : f32 to vector<1x16xf32>
    %65 = arith.divf %64, %63 : vector<1x16xf32>
    %cst_41 = arith.constant dense<0.000000e+00> : vector<16x1xf32>
    %66 = tpu.matmul %62, %65, %cst_41 {dimension_numbers = #tpu.dot_dimension_numbers<[1], [1], [0], [0], [0, 0, 1, 0], [], []>} : vector<16x16xf32>, vector<1x16xf32>, vector<16x1xf32> -> vector<16x1xf32>
    %67 = vector.broadcast %65 : vector<1x16xf32> to vector<16x16xf32>
    %68 = arith.mulf %62, %67 : vector<16x16xf32>
    %cst_42 = arith.constant 1.000000e+00 : f32
    %69 = vector.broadcast %cst_42 : f32 to vector<16x1xf32>
    %70 = arith.divf %69, %66 : vector<16x1xf32>
    %71 = vector.broadcast %70 : vector<16x1xf32> to vector<16x16xf32>
    %72 = arith.mulf %68, %71 : vector<16x16xf32>
    %c0_43 = arith.constant 0 : index
    %c0_44 = arith.constant 0 : index
    %73 = vector.load %arg1[%c0_43, %c0_44] : memref<16x16xf32, #tpu.memory_space<vmem>>, vector<16x16xf32>
    tpu.vector_store %arg1[%c0_43, %c0_44], %72 {strides = array<i32>} : memref<16x16xf32, #tpu.memory_space<vmem>>, vector<16x16xf32>,
    return
  }
}

</mosaic_0001>

<bundles_post_ra>
// kernel: _sinkhorn_impl.1
= control target key start
LH: loop header
LB: loop body
LE: loop exit
PB: predicated region body
PF: predicated region fallthrough
CT: control target
= control target key end

     0   :  { %6 = vsyncpa [#allocation3], 0  ;;  %s1130_s0 = inlined_call_operand.hbm [shape: f32[1,16,16], index: 0, kind: input, shape index: {}]   ;;  %s1131_s1 = inlined_call_operand.hbm [shape: f32[16,16], index: 1, kind: output, shape index: {}]  }
   0x1   :  { %7 = vsyncpa [#allocation4], 0  ;;  %s1003_s6 = smov [#allocation2]   ;;  %s955_s10 = scalar_lea.hbm %s1130_s0, 256 }
   0x2   :  { %s13_s7 = sshll.u32 %s1003_s6, 4  ;;  %p956_p0 = scmp.ne.s32.totalorder %s1130_s0, %s955_s10  ;;  %s14_s7 = int_to_ptr.vmem [resolvable:$true] %s13_s7 }
   0x3   :  { %p959_p1 = scmp.lt.u32.totalorder %s955_s10, %s1130_s0 }
   0x5   :  { %p961_p2 = pnand %p959_p1, %p956_p0 }
   0x7   :  { %964 = shalt.err (!%p961_p2)
}
   0x8   :  { %s965_s15 = scalar_lea.vmem %s14_s7, 256  ;;  %p970_p4 = scmp.lt.s32.totalorder %s14_s7, %s14_s7 }
   0x9   :  { %p966_p3 = scmp.ne.s32.totalorder %s14_s7, %s965_s15  ;;  %p971_p5 = scmp.lt.s32.totalorder %s965_s15, %s965_s15 }
   0xb   :  { %p972_p6 = por %p971_p5, %p970_p4 }
   0xd   :  { %p973_p7 = pnand %p972_p6, %p966_p3 }
   0xf   :  { %976 = shalt.err (!%p973_p7)
}
  0x10   :  { %s1004_s16 = smov 128   ;;  %s1005_s17 = smov 8  }
  0x11   :  { %19 = dma.hbm_to_vmem [thread:$0]  %s1130_s0, 256, %s14_s7, [#allocation3], %s1004_s16, %s1004_s16, %s1005_s17  }
  0x12   :  { %999 = dma.done.wait [#allocation3], 256  }
  0x13   :  { %1000 = vsyncadd [#allocation3], 4294967040  ;;  %v1006_v0 = vmov 0.0|0.0   ;;  %vm1007_vm0 = vmmov 0   ;;  %v1008_v1 = vmov 0.0   ;;  %v23_v2 = vld [vmem:[#allocation2] sm:$0xff]  ;;  %v742_v56 = vlaneseq }
  0x14   :  { %886 = vmatprep.subr.bf16.mxu0 %v1006_v0  ;;  %827 = vmatprep.mubr.msk.f32.mxu0 %vm1007_vm0, %v1008_v1  ;;  %v24_v3 = vld [vmem:[#allocation2 + $0x8] sm:$0xff]  ;;  %vm27_vm1 = vcmask 130048   ;;  %v25_v4 = vadd.f32 0.0001, %v23_v2  ;;  %v1009_v9 = vmov 1.0   ;;  %vm189_vm3 = vcmask 122880  }
  0x15   :  { %889 = vmatprep.subr.bf16.mxu1 %v1006_v0  ;;  %834 = vmatprep.mubr.msk.f32.mxu1 %vm1007_vm0, %v1008_v1  ;;  %v26_v5 = vadd.f32 0.0001, %v24_v3  ;;  %vm1061_vm2 = vmpackc.low %vm27_vm1, %vm27_vm1  ;;  %v743_v58 = vshrl.u32 %v742_v56, 7  ;;  %s1010_s0 = smov [#allocation5]  }
  0x16   :  { %28 = vst.msk [vmem:[#allocation5] sm:$0xff] %vm27_vm1, %v25_v4  ;;  %s767_s20 = sshll.u32 %s1010_s0, 4  ;;  %s768_s20 = int_to_ptr.vmem [resolvable:$true] %s767_s20 }
  0x17   :  { %29 = vst.msk [vmem:[#allocation5 + $0x8] sm:$0xff] %vm27_vm1, %v26_v5  ;;  %v744_v59 = vsub.s32 0, %v743_v58  ;;  %s977_s21 = scalar_lea.vmem %s768_s20, 256  ;;  %p982_p9 = scmp.lt.s32.totalorder %s768_s20, %s768_s20 }
  0x18   :  { %p978_p8 = scmp.ne.s32.totalorder %s768_s20, %s977_s21  ;;  %p983_p10 = scmp.lt.s32.totalorder %s977_s21, %s977_s21 }
  0x1a   :  { %p984_p11 = por %p983_p10, %p982_p9 }
  0x1c   :  { %p985_p12 = pnand %p984_p11, %p978_p8 }
  0x1d   :  { %v1044_v6 = vld [vmem:[#allocation5] sm:$0xff] }
  0x1e   :  { %v1046_v7 = vld [vmem:[#allocation5 + $0x8] sm:$0xff] }
  0x1f   :  { %v1050_v8 = vpack.c.bf16 %v1046_v7, %v1044_v6 }
  0x21   :  { %888 = vmatpush3.bf16.msra.mxu0 %v1050_v8  ;;  %892 = vmatpush3.bf16.xpose.msk.msra.mxu1 %vm1061_vm2, %v1050_v8 }
  0x22   :  { %893 = vmatprep.subr.bf16.mxu0 %v1006_v0  ;;  %900 = vmatprep.subr.bf16.mxu1 %v1006_v0 }
  0x24   :  { %828 = vmatmul.mubr.msk.f32.vlgmr.msra.gmra.mrb[0].mxu0 %vm27_vm1, %v1009_v9 }
  0x25   :  { %895 = vmatpush3.bf16.msra.mxu0 %v1050_v8  ;;  %841 = vmatprep.mubr.msk.f32.mxu0 %vm1007_vm0, %v1008_v1 }
  0x26   :  { %896 = vmatprep.subr.bf16.mxu0 %v1006_v0 }
  0xf7   :  { %v101_v11 = vpop.f32.mrb[0].mxu0 }
  0xf8   :  { %925 = vrcp.f32 %v101_v11  ;;  %v829_v12 = vpop.f32.mrb[1].mxu0 }
 0x102   :  { %v926_v13 = vpop.eup %925 }
 0x103   :  { %835 = vmatmul.mubr.msk.f32.vlgmr.msra.gmra.mrb[0].mxu1 %vm27_vm1, %v926_v13 }
 0x104   :  { %902 = vmatpush3.bf16.msra.mxu1 %v1050_v8  ;;  %855 = vmatprep.mubr.msk.f32.mxu1 %vm1007_vm0, %v1008_v1 }
 0x105   :  { %903 = vmatprep.subr.bf16.mxu1 %v1006_v0 }
 0x1d6   :  { %v182_v14 = vpop.f32.mrb[0].mxu1 }
 0x1d7   :  { %927 = vrcp.f32 %v182_v14  ;;  %v836_v15 = vpop.f32.mrb[1].mxu1 }
 0x1e1   :  { %v928_v16 = vpop.eup %927 }
 0x1e2   :  { %v188_v17 = vand.u32 2147483647, %v928_v16 }
 0x1e4   :  { %v190_v18 = vsel %vm189_vm3, %v188_v17, -inf }
 0x1e5   :  { %191 = vmax.xlane.f32.xlu0 %v190_v18 }
 0x272   :  { %v192_v19 = vpop.xlane.xlu0 %191 }
 0x273   :  { %929 = vrcp.f32 %v192_v19 }
 0x27d   :  { %v930_v20 = vpop.eup %929 }
 0x27e   :  { %v195_v21 = vmul.f32 %v930_v20, %v928_v16 }
 0x280   :  { %842 = vmatmul.mubr.msk.f32.vlgmr.msra.gmra.mrb[2].mxu0 %vm27_vm1, %v195_v21 }
 0x281   :  { %899 = vmatpush3.bf16.xpose.msk.msra.mxu0 %vm1061_vm2, %v1050_v8  ;;  %848 = vmatprep.mubr.msk.f32.mxu0 %vm1007_vm0, %v1008_v1 }
 0x282   :  { %907 = vmatprep.subr.bf16.mxu0 %v1006_v0 }
 0x353   :  { %v265_v22 = vpop.f32.mrb[2].mxu0 }
 0x354   :  { %931 = vrcp.f32 %v265_v22  ;;  %v843_v23 = vpop.f32.mrb[3].mxu0 }
 0x35e   :  { %v932_v24 = vpop.eup %931 }
 0x35f   :  { %849 = vmatmul.mubr.msk.f32.vlgmr.msra.gmra.mrb[4].mxu0 %vm27_vm1, %v932_v24 }
 0x360   :  { %909 = vmatpush3.bf16.msra.mxu0 %v1050_v8  ;;  %869 = vmatprep.mubr.msk.f32.mxu0 %vm1007_vm0, %v1008_v1 }
 0x361   :  { %910 = vmatprep.subr.bf16.mxu0 %v1006_v0 }
 0x432   :  { %v340_v25 = vpop.f32.mrb[4].mxu0 }
 0x433   :  { %933 = vrcp.f32 %v340_v25  ;;  %v850_v26 = vpop.f32.mrb[5].mxu0 }
 0x43d   :  { %v934_v27 = vpop.eup %933 }
 0x43e   :  { %v346_v28 = vand.u32 2147483647, %v934_v27 }
 0x440   :  { %v347_v29 = vsel %vm189_vm3, %v346_v28, -inf }
 0x441   :  { %348 = vmax.xlane.f32.xlu0 %v347_v29 }
 0x4ce   :  { %v349_v30 = vpop.xlane.xlu0 %348 }
 0x4cf   :  { %935 = vrcp.f32 %v349_v30 }
 0x4d9   :  { %v936_v31 = vpop.eup %935 }
 0x4da   :  { %v352_v32 = vmul.f32 %v936_v31, %v934_v27 }
 0x4dc   :  { %856 = vmatmul.mubr.msk.f32.vlgmr.msra.gmra.mrb[2].mxu1 %vm27_vm1, %v352_v32 }
 0x4dd   :  { %906 = vmatpush3.bf16.xpose.msk.msra.mxu1 %vm1061_vm2, %v1050_v8  ;;  %862 = vmatprep.mubr.msk.f32.mxu1 %vm1007_vm0, %v1008_v1 }
 0x4de   :  { %914 = vmatprep.subr.bf16.mxu1 %v1006_v0 }
 0x5af   :  { %v422_v33 = vpop.f32.mrb[2].mxu1 }
 0x5b0   :  { %937 = vrcp.f32 %v422_v33  ;;  %v857_v34 = vpop.f32.mrb[3].mxu1 }
 0x5ba   :  { %v938_v35 = vpop.eup %937 }
 0x5bb   :  { %863 = vmatmul.mubr.msk.f32.vlgmr.msra.gmra.mrb[4].mxu1 %vm27_vm1, %v938_v35 }
 0x5bc   :  { %916 = vmatpush3.bf16.msra.mxu1 %v1050_v8  ;;  %883 = vmatprep.mubr.msk.f32.mxu1 %vm1007_vm0, %v1008_v1 }
 0x68e   :  { %v497_v36 = vpop.f32.mrb[4].mxu1 }
 0x68f   :  { %939 = vrcp.f32 %v497_v36  ;;  %v864_v37 = vpop.f32.mrb[5].mxu1 }
 0x699   :  { %v940_v38 = vpop.eup %939 }
 0x69a   :  { %v503_v39 = vand.u32 2147483647, %v940_v38 }
 0x69c   :  { %v504_v40 = vsel %vm189_vm3, %v503_v39, -inf }
 0x69d   :  { %505 = vmax.xlane.f32.xlu1 %v504_v40 }
 0x72a   :  { %v506_v41 = vpop.xlane.xlu1 %505 }
 0x72b   :  { %941 = vrcp.f32 %v506_v41 }
 0x735   :  { %v942_v42 = vpop.eup %941 }
 0x736   :  { %v509_v43 = vmul.f32 %v942_v42, %v940_v38 }
 0x738   :  { %870 = vmatmul.mubr.msk.f32.vlgmr.msra.gmra.mrb[6].mxu0 %vm27_vm1, %v509_v43 }
 0x739   :  { %913 = vmatpush3.bf16.xpose.msk.msra.mxu0 %vm1061_vm2, %v1050_v8  ;;  %876 = vmatprep.mubr.msk.f32.mxu0 %vm1007_vm0, %v1008_v1 }
 0x80b   :  { %v579_v44 = vpop.f32.mrb[6].mxu0 }
 0x80c   :  { %943 = vrcp.f32 %v579_v44  ;;  %v871_v45 = vpop.f32.mrb[7].mxu0 }
 0x816   :  { %v944_v46 = vpop.eup %943 }
 0x817   :  { %877 = vmatmul.mubr.msk.f32.vlgmr.msra.gmra.mrb[8].mxu0 %vm27_vm1, %v944_v46 }
 0x8ea   :  { %v654_v47 = vpop.f32.mrb[8].mxu0 }
 0x8eb   :  { %945 = vrcp.f32 %v654_v47  ;;  %v878_v48 = vpop.f32.mrb[9].mxu0 }
 0x8f5   :  { %v946_v49 = vpop.eup %945 }
 0x8f6   :  { %v660_v50 = vand.u32 2147483647, %v946_v49 }
 0x8f8   :  { %v661_v51 = vsel %vm189_vm3, %v660_v50, -inf }
 0x8f9   :  { %662 = vmax.xlane.f32.xlu1 %v661_v51 }
 0x986   :  { %v663_v52 = vpop.xlane.xlu1 %662 }
 0x987   :  { %947 = vrcp.f32 %v663_v52 }
 0x991   :  { %v948_v53 = vpop.eup %947 }
 0x992   :  { %v666_v54 = vmul.f32 %v948_v53, %v946_v49 }
 0x994   :  { %884 = vmatmul.mubr.msk.f32.vlgmr.msra.gmra.mrb[6].mxu1 %vm27_vm1, %v666_v54 }
 0xa67   :  { %v736_v55 = vpop.f32.mrb[6].mxu1 }
 0xa68   :  { %949 = vrcp.f32 %v736_v55  ;;  %v885_v57 = vpop.f32.mrb[7].mxu1 }
 0xa72   :  { %v950_v60 = vpop.eup %949 }
 0xa73   :  { %v745_v61 = vrot.slane %v950_v60, %v744_v59 }
 0xa75   :  { %v747_v62 = vmul.f32 %v745_v61, %v1046_v7  ;;  %v746_v63 = vmul.f32 %v745_v61, %v1044_v6 }
 0xa77   :  { %v751_v0 = vsel %vm27_vm1, %v747_v62, 0.0  ;;  %v748_v1 = vsel %vm27_vm1, %v746_v63, 0.0 }
 0xa78   :  { %752 = vadd.xlane.f32.xlu1 %v751_v0  ;;  %749 = vadd.xlane.f32.xlu0 %v748_v1 }
 0xb05   :  { %v753_v2 = vpop.xlane.xlu1 %752  ;;  %v750_v3 = vpop.xlane.xlu0 %749 }
 0xb06   :  { %951 = vrcp.f32 %v753_v2 }
 0xb07   :  { %953 = vrcp.f32 %v750_v3 }
 0xb10   :  { %v952_v4 = vpop.eup %951 }
 0xb11   :  { %v954_v5 = vpop.eup %953  ;;  %v759_v8 = vmul.f32 %v952_v4, %v747_v62 }
 0xb12   :  { %v758_v9 = vmul.f32 %v954_v5, %v746_v63 }
 0xb13   :  { %761 = vst.msk [vmem:[#allocation5 + $0x8] sm:$0xff] %vm27_vm1, %v759_v8 }
 0xb14   :  { %760 = vst.msk [vmem:[#allocation5] sm:$0xff] %vm27_vm1, %v758_v9 }
 0xb15   :  { %988 = shalt.err (!%p985_p12)
}
 0xb16   :  { %s989_s24 = scalar_lea.hbm %s1131_s1, 256 }
 0xb17   :  { %p990_p13 = scmp.ne.s32.totalorder %s1131_s1, %s989_s24  ;;  %p993_p0 = scmp.lt.u32.totalorder %s989_s24, %s1131_s1 }
 0xb19   :  { %p995_p1 = pnand %p993_p0, %p990_p13 }
 0xb1b   :  { %998 = shalt.err (!%p995_p1)
}
 0xb1c   :  { %773 = dma.vmem_to_hbm [thread:$0]  %s768_s20, 256, %s1131_s1, [#allocation4], %s1004_s16, %s1004_s16, %s1005_s17  }
 0xb1d   :  { %1001 = dma.done.wait [#allocation4], 256  }
 0xb1e   :  { %1002 = vsyncadd [#allocation4], 4294967040 }
 0xb1f   :  { %777 = vsyncpa [#allocation3], 1 }
 0xb20   :  { %778 = vsyncpa [#allocation4], 1 }

</bundles_post_ra>
